<compile_context>
chip_gen: v5e
topology: v5e:2x2
jax: 0.10.0
libtpu: 0.0.40
codegen_flags: <defaults>
</compile_context>

<pallas_src>
import math

import jax
import jax.numpy as jnp
from jax import lax
from jax.experimental import pallas as pl
from jax.experimental.pallas import tpu as pltpu


# ---------------------------------------------------------------------------
# Kernel bodies
# ---------------------------------------------------------------------------

def _packed_probs(x, w_bd, b, seg_ones):
    """Segmented softmax over P packed segments of a lane-dense (tm, 128) tile."""
    logits = jnp.dot(x.astype(jnp.float32), w_bd,
                     preferred_element_type=jnp.float32) + b
    # One shift constant per *physical* row.  Softmax is shift-invariant and the
    # physical-row max upper-bounds every packed segment's max, so this matches
    # the reference up to f32 exp underflow (only reachable if logits of rows
    # packed together differ by >~100 — not a realistic regime for a gating net).
    m = jnp.max(logits, axis=-1, keepdims=True)
    e = jnp.exp(logits - m)
    # Segmented sums, broadcast back over each segment's lanes, via one tiny MXU
    # matmul with a block-diagonal ones matrix (keeps everything lane-dense).
    denom = jnp.dot(e, seg_ones, preferred_element_type=jnp.float32)
    return e * pl.reciprocal(denom, approx=True)


def _plain_probs(x, w, b):
    """Row softmax for the already-lane-dense case (A >= 128 or A not dividing 128)."""
    logits = lax.dot_general(
        x.astype(jnp.float32), w,
        dimension_numbers=(((1,), (1,)), ((), ())),   # x @ W^T, W in native [out, in]
        preferred_element_type=jnp.float32) + b
    m = jnp.max(logits, axis=-1, keepdims=True)
    e = jnp.exp(logits - m)
    denom = jnp.sum(e, axis=-1, keepdims=True)
    return e * pl.reciprocal(denom, approx=True)


def _packed_cross_kernel(x_ref, z_ref, w_ref, b_ref, seg_ref, o_ref):
    probs = _packed_probs(x_ref[...], w_ref[...], b_ref[...], seg_ref[...])
    o_ref[...] = (z_ref[...].astype(jnp.float32) * probs).astype(o_ref.dtype)


def _packed_self_kernel(x_ref, w_ref, b_ref, seg_ref, o_ref):
    x = x_ref[...]                                   # reuse x for gating: no z stream
    probs = _packed_probs(x, w_ref[...], b_ref[...], seg_ref[...])
    o_ref[...] = (x.astype(jnp.float32) * probs).astype(o_ref.dtype)


def _plain_cross_kernel(x_ref, z_ref, w_ref, b_ref, o_ref):
    probs = _plain_probs(x_ref[...], w_ref[...], b_ref[...])
    o_ref[...] = (z_ref[...].astype(jnp.float32) * probs).astype(o_ref.dtype)


def _plain_self_kernel(x_ref, w_ref, b_ref, o_ref):
    x = x_ref[...]
    probs = _plain_probs(x, w_ref[...], b_ref[...])
    o_ref[...] = (x.astype(jnp.float32) * probs).astype(o_ref.dtype)


# ---------------------------------------------------------------------------
# Wrapper
# ---------------------------------------------------------------------------

def _round_up(n, m):
    return ((n + m - 1) // m) * m


def attention_net(x, weight, bias, z=None, *, tm=2048):
    """Pallas implementation of AttentionNet.forward.

    x      : (..., A)  attention base
    weight : (A, A)    PyTorch Linear weight, layout [out_features, in_features]
    bias   : (A,)      PyTorch Linear bias
    z      : optional (..., A); if None -> self gating (out = x * softmax(...))
    tm     : max row tile (in packed rows) per grid step; auto-clamped for VMEM.
    """
    A = x.shape[-1]
    lead = x.shape[:-1]
    M = math.prod(lead)
    out_dtype = x.dtype

    # dtype-aware minimum sublane multiple (8 for f32, 16 for bf16, 32 for int8),
    # driven by the narrowest streamed dtype.
    itemsize = jnp.dtype(x.dtype).itemsize
    if z is not None:
        itemsize = min(itemsize, jnp.dtype(z.dtype).itemsize)
    sub = max(8, 32 // max(itemsize, 1))

    # Lane packing: fold P = 128 // A logical rows into one 128-lane physical row.
    packed = (A < 128) and (128 % A == 0)
    P = (128 // A) if packed else 1
    lanes = P * A

    x2 = x.reshape(M, A)
    z2 = None if z is None else z.reshape(M, A)

    rows = -(-M // P)                                  # packed rows needed
    # Tile: multiple of `sub`, no bigger than the (padded) problem, and <=~2 MiB
    # per f32 stream tile so double-buffered tiles + f32 intermediates stay well
    # under the 32 MiB scoped-VMEM budget on every generation (v5e/v6e/v7x).
    cap = max(sub, ((2 << 20) // (lanes * 4)) // sub * sub)
    tm_eff = max(sub, (min(tm, cap, _round_up(rows, sub)) // sub) * sub)
    rows_pad = _round_up(rows, tm_eff)
    m_pad = rows_pad * P

    if m_pad != M:                                     # zero-pad the row tail
        x2 = jnp.pad(x2, ((0, m_pad - M), (0, 0)))
        if z2 is not None:
            z2 = jnp.pad(z2, ((0, m_pad - M), (0, 0)))

    xp = x2.reshape(rows_pad, lanes)                   # contiguous => free reshape
    zp = None if z2 is None else z2.reshape(rows_pad, lanes)

    # Grid-resident operands, pre-cast to f32 once in the wrapper (tiny, one-time).
    w32 = weight.astype(jnp.float32)
    b32 = bias.astype(jnp.float32)
    if packed:
        eye = jnp.eye(P, dtype=jnp.float32)
        w_in = jnp.kron(eye, w32.T)                    # (lanes, lanes) block-diag W^T
        seg = jnp.kron(eye, jnp.ones((A, A), jnp.float32))
        b_in = jnp.tile(b32, P).reshape(1, lanes)
    else:
        w_in = w32                                     # native [out, in]; contracted in-kernel
        seg = None
        b_in = b32.reshape(1, lanes)

    grid = (rows_pad // tm_eff,)
    row_spec = pl.BlockSpec((tm_eff, lanes), lambda i: (i, 0))

    inputs = [xp]
    in_specs = [row_spec]
    if zp is not None:
        inputs.append(zp)
        in_specs.append(row_spec)
    inputs.append(w_in)
    in_specs.append(pl.BlockSpec(w_in.shape, lambda i: (0, 0)))
    inputs.append(b_in)
    in_specs.append(pl.BlockSpec((1, lanes), lambda i: (0, 0)))
    if packed:
        inputs.append(seg)
        in_specs.append(pl.BlockSpec((lanes, lanes), lambda i: (0, 0)))

    if packed:
        kernel = _packed_cross_kernel if zp is not None else _packed_self_kernel
    else:
        kernel = _plain_cross_kernel if zp is not None else _plain_self_kernel

    out = pl.pallas_call(
        kernel,
        out_shape=jax.ShapeDtypeStruct((rows_pad, lanes), out_dtype),
        grid_spec=pltpu.PrefetchScalarGridSpec(
            num_scalar_prefetch=0,
            grid=grid,
            in_specs=in_specs,
            out_specs=row_spec,
        ),
        compiler_params=pltpu.CompilerParams(
            dimension_semantics=("parallel",),         # row axis shards across TCs (v7x)
            vmem_limit_bytes=32 * 1024 * 1024,         # >= default on all gens, safe on v7x
        ),
    )(*inputs)

    out = out.reshape(m_pad, A)[:M]
    return out.reshape(*lead, A)


# ---------------------------------------------------------------------------
# Reference & test
# ---------------------------------------------------------------------------

def _reference(x, weight, bias, z=None):
    """Pure-JAX reference matching the PyTorch forward."""
    if z is None:
        z = x
    logits = x @ weight.T + bias
    return z * jax.nn.softmax(logits, axis=-1)


if __name__ == "__main__":
    key = jax.random.PRNGKey(0)
    k_x, k_z, k_w, k_b, k_xr, k_w2, k_b2, k_xm = jax.random.split(key, 8)

    batch, seq, attention_size = 2, 8, 32

    # Deterministic "module init" mirroring nn.Linear's default init range.
    bound = 1.0 / (attention_size ** 0.5)
    weight = jax.random.uniform(
        k_w, (attention_size, attention_size), jnp.float32, -bound, bound)
    bias = jax.random.uniform(
        k_b, (attention_size,), jnp.float32, -bound, bound)

    x = jax.random.normal(k_x, (batch, seq, attention_size), jnp.float32)
    z = jax.random.normal(k_z, (batch, seq, attention_size), jnp.float32)

    tol = dict(atol=2e-3, rtol=2e-3)   # approx (EUP) reciprocal in the softmax denom

    # Self-attention path (z=None, packed lane-dense kernel) and cross path.
    out_self = jax.block_until_ready(attention_net(x, weight, bias))
    out_cross = jax.block_until_ready(attention_net(x, weight, bias, z=z))
    assert jnp.allclose(out_self, _reference(x, weight, bias), **tol)
    assert jnp.allclose(out_cross, _reference(x, weight, bias, z=z), **tol)

    # Ragged row count (batch*seq not a multiple of the tile / packing factor).
    x_r = jax.random.normal(k_xr, (3, 5, attention_size), jnp.float32)
    out_r = jax.block_until_ready(attention_net(x_r, weight, bias))
    assert jnp.allclose(out_r, _reference(x_r, weight, bias), **tol)

    # Multi-tile grid (tm override forces several grid steps + padded tail).
    x_m = jax.random.normal(k_xm, (3, 40, attention_size), jnp.float32)
    z_m = jax.random.normal(k_z, (3, 40, attention_size), jnp.float32)
    out_m = jax.block_until_ready(attention_net(x_m, weight, bias, z=z_m, tm=8))
    assert jnp.allclose(out_m, _reference(x_m, weight, bias, z=z_m), **tol)

    # Already lane-dense feature size exercises the non-packed kernel path.
    A2 = 128
    bound2 = 1.0 / (A2 ** 0.5)
    weight2 = jax.random.uniform(k_w2, (A2, A2), jnp.float32, -bound2, bound2)
    bias2 = jax.random.uniform(k_b2, (A2,), jnp.float32, -bound2, bound2)
    x_big = jax.random.normal(k_x, (batch, seq, A2), jnp.float32)
    out_big = jax.block_until_ready(attention_net(x_big, weight2, bias2))
    assert jnp.allclose(out_big, _reference(x_big, weight2, bias2), **tol)

    print("KERNEL_OK")
</pallas_src>

<mosaic_0001>
module attributes {stable_mosaic.version = 11 : i64} {
  func.func @_packed_self_kernel(%arg0: i32, %arg1: memref<8x128xf32, #tpu.memory_space<vmem>>, %arg2: memref<128x128xf32, #tpu.memory_space<vmem>>, %arg3: memref<1x128xf32, #tpu.memory_space<vmem>>, %arg4: memref<128x128xf32, #tpu.memory_space<vmem>>, %arg5: memref<8x128xf32, #tpu.memory_space<vmem>>) attributes {dimension_semantics = [#tpu.dimension_semantics<parallel>], iteration_bounds = array<i64: 1>, scalar_prefetch = 0 : i64, scratch_operands = 0 : i64, tpu.core_type = #tpu.core_type<tc>, window_params = [{transform_indices = @transform_0, window_bounds = array<i64: 8, 128>}, {pipeline_mode = #tpu.pipeline_mode<synchronous>, transform_indices = @transform_1, window_bounds = array<i64: 128, 128>}, {pipeline_mode = #tpu.pipeline_mode<synchronous>, transform_indices = @transform_2, window_bounds = array<i64: 1, 128>}, {pipeline_mode = #tpu.pipeline_mode<synchronous>, transform_indices = @transform_3, window_bounds = array<i64: 128, 128>}, {transform_indices = @transform_4, window_bounds = array<i64: 8, 128>}]} {
    %c0 = arith.constant 0 : index
    %c0_0 = arith.constant 0 : index
    %0 = vector.load %arg1[%c0, %c0_0] : memref<8x128xf32, #tpu.memory_space<vmem>>, vector<8x128xf32>
    %c0_1 = arith.constant 0 : index
    %c0_2 = arith.constant 0 : index
    %1 = vector.load %arg2[%c0_1, %c0_2] : memref<128x128xf32, #tpu.memory_space<vmem>>, vector<128x128xf32>
    %c0_3 = arith.constant 0 : index
    %c0_4 = arith.constant 0 : index
    %2 = vector.load %arg3[%c0_3, %c0_4] : memref<1x128xf32, #tpu.memory_space<vmem>>, vector<1x128xf32>
    %c0_5 = arith.constant 0 : index
    %c0_6 = arith.constant 0 : index
    %3 = vector.load %arg4[%c0_5, %c0_6] : memref<128x128xf32, #tpu.memory_space<vmem>>, vector<128x128xf32>
    %cst = arith.constant dense<0.000000e+00> : vector<8x128xf32>
    %4 = tpu.matmul %0, %1, %cst {dimension_numbers = #tpu.dot_dimension_numbers<[1], [0], [0], [1], [0, 0, 1, 1], [], []>} : vector<8x128xf32>, vector<128x128xf32>, vector<8x128xf32> -> vector<8x128xf32>
    %5 = vector.broadcast %2 : vector<1x128xf32> to vector<8x128xf32>
    %6 = arith.addf %4, %5 : vector<8x128xf32>
    %cst_7 = arith.constant dense<0xFF800000> : vector<8xf32>
    %7 = vector.multi_reduction <maximumf>, %6, %cst_7 [1] : vector<8x128xf32> to vector<8xf32>
    %8 = vector.shape_cast %7 : vector<8xf32> to vector<8x1xf32>
    %9 = vector.broadcast %8 : vector<8x1xf32> to vector<8x128xf32>
    %10 = arith.subf %6, %9 : vector<8x128xf32>
    %11 = math.exp %10 : vector<8x128xf32>
    %cst_8 = arith.constant dense<0.000000e+00> : vector<8x128xf32>
    %12 = tpu.matmul %11, %3, %cst_8 {dimension_numbers = #tpu.dot_dimension_numbers<[1], [0], [0], [1], [0, 0, 1, 1], [], []>} : vector<8x128xf32>, vector<128x128xf32>, vector<8x128xf32> -> vector<8x128xf32>
    %13 = tpu.reciprocal %12 {approx = true} : vector<8x128xf32> -> vector<8x128xf32>
    %14 = arith.mulf %11, %13 : vector<8x128xf32>
    %15 = arith.mulf %0, %14 : vector<8x128xf32>
    %c0_9 = arith.constant 0 : index
    %c0_10 = arith.constant 0 : index
    %16 = vector.load %arg5[%c0_9, %c0_10] : memref<8x128xf32, #tpu.memory_space<vmem>>, vector<8x128xf32>
    tpu.vector_store %arg5[%c0_9, %c0_10], %15 {strides = array<i32>} : memref<8x128xf32, #tpu.memory_space<vmem>>, vector<8x128xf32>,
    return
  }
  func.func @transform_0(%arg0: i32) -> (i32, i32) {
    %c0_i32 = arith.constant 0 : i32
    %c0_i32_0 = arith.constant 0 : i32
    return %arg0, %c0_i32 : i32, i32
  }
  func.func @transform_1(%arg0: i32) -> (i32, i32) {
    %c0_i32 = arith.constant 0 : i32
    %c0_i32_0 = arith.constant 0 : i32
    %c0_i32_1 = arith.constant 0 : i32
    return %c0_i32, %c0_i32_0 : i32, i32
  }
  func.func @transform_2(%arg0: i32) -> (i32, i32) {
    %c0_i32 = arith.constant 0 : i32
    %c0_i32_0 = arith.constant 0 : i32
    %c0_i32_1 = arith.constant 0 : i32
    return %c0_i32, %c0_i32_0 : i32, i32
  }
  func.func @transform_3(%arg0: i32) -> (i32, i32) {
    %c0_i32 = arith.constant 0 : i32
    %c0_i32_0 = arith.constant 0 : i32
    %c0_i32_1 = arith.constant 0 : i32
    return %c0_i32, %c0_i32_0 : i32, i32
  }
  func.func @transform_4(%arg0: i32) -> (i32, i32) {
    %c0_i32 = arith.constant 0 : i32
    %c0_i32_0 = arith.constant 0 : i32
    return %arg0, %c0_i32 : i32, i32
  }
}

</mosaic_0001>

<bundles_post_ra>
// kernel: tpu_custom_call.1
= control target key start
LH: loop header
LB: loop body
LE: loop exit
PB: predicated region body
PF: predicated region fallthrough
CT: control target
= control target key end

     0   :  { %9 = vsyncpa [#allocation3], 0  ;;  %s326_s0 = inlined_call_operand.hbm [shape: f32[8,128], index: 0, kind: input, shape index: {}]   ;;  %s327_s1 = inlined_call_operand.hbm [shape: f32[128,128], index: 1, kind: input, shape index: {}]   ;;  %s328_s2 = inlined_call_operand.vmem [shape: f32[1,128], index: 2, kind: input, shape index: {}]   ;;  %s329_s3 = inlined_call_operand.hbm [shape: f32[128,128], index: 3, kind: input, shape index: {}]   ;;  %s330_s4 = inlined_call_operand.hbm [shape: f32[8,128], index: 4, kind: output, shape index: {}]  }
   0x1   :  { %10 = vsyncpa [#allocation6], 0  ;;  %s27_s17 = sshll.u32 %s327_s1, 4  ;;  %s28_s17 = int_to_ptr.hbm [resolvable:$true] %s27_s17 }
   0x2   :  { %11 = vsyncpa [#allocation4], 0  ;;  %s280_s18 = smov [#allocation5]   ;;  %s17_s22 = sshll.u32 %s326_s0, 4  ;;  %s18_s22 = int_to_ptr.hbm [resolvable:$true] %s17_s22 }
   0x3   :  { %s29_s19 = sshll.u32 %s280_s18, 4  ;;  %s281_s23 = smov 128   ;;  %s30_s19 = int_to_ptr.vmem [resolvable:$true] %s29_s19 }
   0x4   :  { %s282_s24 = smov 8   ;;  %s283_s25 = smov [#allocation2]  }
   0x5   :  { %35 = dma.hbm_to_vmem [thread:$0]  %s28_s17, 2048, %s30_s19, [#allocation6], %s281_s23, %s281_s23, %s282_s24  }
   0x6   :  { %s19_s26 = sshll.u32 %s283_s25, 4  ;;  %s42_s29 = sshll.u32 %s329_s3, 4  ;;  %s20_s26 = int_to_ptr.vmem [resolvable:$true] %s19_s26  ;;  %s43_s29 = int_to_ptr.hbm [resolvable:$true] %s42_s29 }
   0x7   :  { %22 = dma.hbm_to_vmem [thread:$0]  %s18_s22, 128, %s20_s26, [#allocation3]  }
   0x8   :  { %s284_s1 = smov [#allocation7]  }
   0x9   :  { %s44_s30 = sshll.u32 %s284_s1, 4  ;;  %s45_s30 = int_to_ptr.vmem [resolvable:$true] %s44_s30 }
   0xa   :  { %50 = dma.hbm_to_vmem [thread:$0]  %s43_s29, 2048, %s45_s30, [#allocation6], %s281_s23, %s281_s23, %s282_s24  }
   0xb   :  { %274 = dma.done.wait [#allocation3], 128  }
   0xc   :  { %275 = vsyncadd [#allocation3], 4294967168 }
   0xd   :  { %276 = dma.done.wait [#allocation6], 4096  }
   0xe   :  { %277 = vsyncadd [#allocation6], 4294963200  ;;  %v79_v0 = vld [vmem:[#allocation5 + $0x78] sm:$0xff]  ;;  %v78_v1 = vld [vmem:[#allocation5 + $0x70] sm:$0xff]  ;;  %s156_s8 = sshll.u32 %s330_s4, 4  ;;  %s157_s8 = int_to_ptr.hbm [resolvable:$true] %s156_s8 }
   0xf   :  { %100 = vmatpush.msra.mxu0 %v79_v0  ;;  %v77_v2 = vld [vmem:[#allocation5 + $0x68] sm:$0xff]  ;;  %v76_v3 = vld [vmem:[#allocation5 + $0x60] sm:$0xff]  ;;  %v75_v4 = vld [vmem:[#allocation5 + $0x58] sm:$0xff] }
  0x10   :  { %v74_v5 = vld [vmem:[#allocation5 + $0x50] sm:$0xff]  ;;  %v73_v6 = vld [vmem:[#allocation5 + $0x48] sm:$0xff]  ;;  %v72_v7 = vld [vmem:[#allocation5 + $0x40] sm:$0xff] }
  0x11   :  { %101 = vmatpush.msra.mxu0 %v78_v1  ;;  %v71_v8 = vld [vmem:[#allocation5 + $0x38] sm:$0xff]  ;;  %v70_v9 = vld [vmem:[#allocation5 + $0x30] sm:$0xff]  ;;  %v69_v10 = vld [vmem:[#allocation5 + $0x28] sm:$0xff] }
  0x12   :  { %v68_v11 = vld [vmem:[#allocation5 + $0x20] sm:$0xff]  ;;  %v67_v12 = vld [vmem:[#allocation5 + $0x18] sm:$0xff]  ;;  %v66_v13 = vld [vmem:[#allocation5 + $0x10] sm:$0xff] }
  0x13   :  { %102 = vmatpush.msra.mxu0 %v77_v2  ;;  %v65_v14 = vld [vmem:[#allocation5 + $0x8] sm:$0xff]  ;;  %v64_v15 = vld [vmem:[#allocation5] sm:$0xff]  ;;  %v63_v16 = vld [vmem:[#allocation2] sm:$0xff] }
  0x14   :  { %v96_v17 = vld [vmem:[#allocation7 + $0x78] sm:$0xff]  ;;  %v95_v18 = vld [vmem:[#allocation7 + $0x70] sm:$0xff]  ;;  %v94_v19 = vld [vmem:[#allocation7 + $0x68] sm:$0xff] }
  0x15   :  { %103 = vmatpush.msra.mxu0 %v76_v3  ;;  %125 = vmatpush.msra.mxu1 %v96_v17  ;;  %v93_v20 = vld [vmem:[#allocation7 + $0x60] sm:$0xff]  ;;  %v92_v21 = vld [vmem:[#allocation7 + $0x58] sm:$0xff]  ;;  %v91_v22 = vld [vmem:[#allocation7 + $0x50] sm:$0xff] }
  0x16   :  { %v90_v23 = vld [vmem:[#allocation7 + $0x48] sm:$0xff]  ;;  %v89_v24 = vld [vmem:[#allocation7 + $0x40] sm:$0xff]  ;;  %v88_v25 = vld [vmem:[#allocation7 + $0x38] sm:$0xff] }
  0x17   :  { %104 = vmatpush.msra.mxu0 %v75_v4  ;;  %126 = vmatpush.msra.mxu1 %v95_v18  ;;  %v87_v26 = vld [vmem:[#allocation7 + $0x30] sm:$0xff]  ;;  %v173_v27 = vld [vmem:[%s328_s2] ss:$0 sm:$0xff]  ;;  %v86_v30 = vld [vmem:[#allocation7 + $0x28] sm:$0xff]  ;;  %s285_s2 = smov [#allocation8]  }
  0x18   :  { %v85_v31 = vld [vmem:[#allocation7 + $0x20] sm:$0xff]  ;;  %v84_v32 = vld [vmem:[#allocation7 + $0x18] sm:$0xff]  ;;  %v83_v33 = vld [vmem:[#allocation7 + $0x10] sm:$0xff]  ;;  %s154_s5 = sshll.u32 %s285_s2, 4  ;;  %s155_s5 = int_to_ptr.vmem [resolvable:$true] %s154_s5 }
  0x19   :  { %105 = vmatpush.msra.mxu0 %v74_v5  ;;  %127 = vmatpush.msra.mxu1 %v94_v19  ;;  %v82_v34 = vld [vmem:[#allocation7 + $0x8] sm:$0xff]  ;;  %v81_v35 = vld [vmem:[#allocation7] sm:$0xff] }
  0x1b   :  { %106 = vmatpush.msra.mxu0 %v73_v6  ;;  %128 = vmatpush.msra.mxu1 %v93_v20 }
  0x1d   :  { %107 = vmatpush.msra.mxu0 %v72_v7  ;;  %129 = vmatpush.msra.mxu1 %v92_v21 }
  0x1f   :  { %108 = vmatpush.msra.mxu0 %v71_v8  ;;  %130 = vmatpush.msra.mxu1 %v91_v22 }
  0x21   :  { %109 = vmatpush.msra.mxu0 %v70_v9  ;;  %131 = vmatpush.msra.mxu1 %v90_v23 }
  0x23   :  { %110 = vmatpush.msra.mxu0 %v69_v10  ;;  %132 = vmatpush.msra.mxu1 %v89_v24 }
  0x25   :  { %111 = vmatpush.msra.mxu0 %v68_v11  ;;  %133 = vmatpush.msra.mxu1 %v88_v25 }
  0x27   :  { %112 = vmatpush.msra.mxu0 %v67_v12  ;;  %134 = vmatpush.msra.mxu1 %v87_v26 }
  0x29   :  { %113 = vmatpush.msra.mxu0 %v66_v13  ;;  %135 = vmatpush.msra.mxu1 %v86_v30 }
  0x2b   :  { %114 = vmatpush.msra.mxu0 %v65_v14  ;;  %136 = vmatpush.msra.mxu1 %v85_v31 }
  0x2d   :  { %115 = vmatpush.msra.mxu0 %v64_v15  ;;  %137 = vmatpush.msra.mxu1 %v84_v32 }
  0x2e   :  { %116 = vmatmul.f32.vlgmr.msra.gmra.mxu0 %v63_v16 }
  0x2f   :  { %138 = vmatpush.msra.mxu1 %v83_v33 }
  0x31   :  { %139 = vmatpush.msra.mxu1 %v82_v34 }
  0x33   :  { %140 = vmatpush.msra.mxu1 %v81_v35 }
  0xab   :  { %v117_v28 = vpop.f32.mrf.mxu0 }
  0xac   :  { %v118_v29 = vadd.f32 %v173_v27, %v117_v28 }
  0xae   :  { %120 = vmax.xlane.f32.xlu0 %v118_v29 }
 0x121   :  { %v121_v36 = vpop.xlane.xlu0 %120 }
 0x122   :  { %v122_v37 = vsub.f32 %v118_v29, %v121_v36 }
 0x124   :  { %v123_v38 = vmul.f32 1.442695, %v122_v37 }
 0x126   :  { %174 = vpow2.f32 %v123_v38 }
 0x12c   :  { %v175_v39 = vpop.eup %174 }
 0x12d   :  { %141 = vmatmul.f32.vlgmr.msra.gmra.mxu1 %v175_v39 }
 0x1aa   :  { %v142_v40 = vpop.f32.mrf.mxu1 }
 0x1ab   :  { %176 = vrcp.f32 %v142_v40 }
 0x1b1   :  { %v177_v41 = vpop.eup %176 }
 0x1b2   :  { %v146_v42 = vmul.f32 %v177_v41, %v175_v39 }
 0x1b4   :  { %v147_v43 = vmul.f32 %v146_v42, %v63_v16 }
 0x1b6   :  { %148 = vst [vmem:[#allocation8] sm:$0xff] %v147_v43 }
 0x1b7   :  { %159 = dma.vmem_to_hbm [thread:$0]  %s155_s5, 128, %s157_s8, [#allocation4]  }
 0x1b8   :  { %278 = dma.done.wait [#allocation4], 128  }
 0x1b9   :  { %279 = vsyncadd [#allocation4], 4294967168 }
 0x1ba   :  { %164 = vsyncpa [#allocation3], 1 }
 0x1bb   :  { %165 = vsyncpa [#allocation6], 1 }
 0x1bc   :  { %166 = vsyncpa [#allocation4], 1 }

</bundles_post_ra>
